<compile_context>
chip_gen: v7x
topology: tpu7x:2x2x1
jax: 0.10.0
libtpu: 0.0.40
codegen_flags: <defaults>
</compile_context>

<pallas_src>
import functools
import math

import jax
import jax.numpy as jnp
from jax.experimental import pallas as pl
from jax.experimental.pallas import tpu as pltpu


def _round_up(x, m):
    return ((x + m - 1) // m) * m


def _tile_plan(K, N):
    """Static tiling plan shared by parameter prep and the forward pass."""
    # K tile: multiple of 128 (lane quantum for x, sublane-aligned for w).
    # Bump toward 1024-2048 for very large K on v5e/v6e (128 MiB VMEM).
    tk = min(512, _round_up(K, 128))
    K_pad = _round_up(K, tk)
    # N tile: lane-dense output, multiple of 128.
    N_pad = _round_up(N, 128)
    tn = 256 if N_pad % 256 == 0 else 128
    return tk, K_pad, tn, N_pad


def _batch_plan(B):
    """Batch padded to the 8-sublane quantum, tiled at 256 rows max."""
    B_pad = _round_up(max(B, 8), 8)
    tb = min(B_pad, 256)
    B_pad = _round_up(B_pad, tb)
    return tb, B_pad


def _linear_kernel(x_ref, w_ref, b_ref, o_ref, acc_ref):
    # x_ref: (tb, tk), w_ref: (tk, tn), b_ref: (1, tn)
    # o_ref: (tb, tn), acc_ref: (tb, tn) f32 scratch accumulator.
    k = pl.program_id(2)

    @pl.when(k == 0)
    def _():
        # Fold the bias add into the accumulator init (saves a separate VPU
        # add + VMEM read in the epilogue).
        acc_ref[...] = jnp.broadcast_to(
            b_ref[...].astype(jnp.float32), acc_ref.shape
        )

    acc_ref[...] += jnp.dot(
        x_ref[...], w_ref[...], preferred_element_type=jnp.float32
    )

    @pl.when(k == pl.num_programs(2) - 1)
    def _():
        o_ref[...] = acc_ref[...].astype(o_ref.dtype)


def prepare_class_head_params(weight, bias):
    """One-time parameter prep (do this at init / checkpoint-load time).

    weight: (num_classes, K) -- PyTorch nn.Linear convention
    bias:   (num_classes,)
    Returns (K_pad, N_pad) transposed/zero-padded weight and (1, N_pad) bias.
    Zero padding contributes nothing to the matmul; the forward slices the
    output back to num_classes.
    """
    N, K = weight.shape
    _, K_pad, _, N_pad = _tile_plan(K, N)
    w_kn = jnp.zeros((K_pad, N_pad), weight.dtype).at[:K, :N].set(weight.T)
    b2d = jnp.zeros((1, N_pad), bias.dtype).at[0, :N].set(bias)
    return w_kn, b2d


@functools.partial(jax.jit, static_argnames=("num_classes",))
def class_head_forward(x, w_kn, b2d, num_classes):
    """Equivalent of ClassHead.forward (Flatten + Linear).

    x:    (B, C, H, W) float32 (NCHW, like PyTorch)
    w_kn: (K_pad, N_pad) from prepare_class_head_params
    b2d:  (1, N_pad)   from prepare_class_head_params
    returns (B, num_classes)
    """
    B = x.shape[0]
    K = math.prod(x.shape[1:])          # static Python int (no tracers)
    tk, K_pad, tn, N_pad = _tile_plan(K, num_classes)
    assert w_kn.shape == (K_pad, N_pad), (w_kn.shape, (K_pad, N_pad))
    assert b2d.shape == (1, N_pad)

    x_flat = x.reshape(B, K)            # nn.Flatten (row-major, matches torch)

    tb, B_pad = _batch_plan(B)
    x_flat = jnp.pad(x_flat, ((0, B_pad - B), (0, K_pad - K)))

    # K (reduction) is the LAST grid axis; B and N tiles are parallel.
    grid = (B_pad // tb, N_pad // tn, K_pad // tk)

    flops = 2 * B_pad * K_pad * N_pad
    bytes_accessed = 4 * (B_pad * K_pad + K_pad * N_pad + N_pad + B_pad * N_pad)

    out = pl.pallas_call(
        _linear_kernel,
        out_shape=jax.ShapeDtypeStruct((B_pad, N_pad), x.dtype),
        grid=grid,
        in_specs=[
            pl.BlockSpec((tb, tk), lambda b, n, k: (b, k)),   # activations
            pl.BlockSpec((tk, tn), lambda b, n, k: (k, n)),   # weight stream
            pl.BlockSpec((1, tn), lambda b, n, k: (0, n)),    # bias
        ],
        out_specs=pl.BlockSpec((tb, tn), lambda b, n, k: (b, n)),
        scratch_shapes=[pltpu.VMEM((tb, tn), jnp.float32)],
        compiler_params=pltpu.CompilerParams(
            # B/N tile axes parallel (2 TCs on v7x), K reduction arbitrary.
            dimension_semantics=("parallel", "parallel", "arbitrary"),
            # Explicit VMEM budget with headroom for v7x (64 MiB physical).
            vmem_limit_bytes=48 * 1024 * 1024,
        ),
        cost_estimate=pl.CostEstimate(
            flops=flops, transcendentals=0, bytes_accessed=bytes_accessed
        ),
    )(x_flat, w_kn, b2d)

    return out[:B, :num_classes]


def init_class_head_params(key, input_features, num_classes):
    """Deterministic init mirroring nn.Linear default (uniform +/- 1/sqrt(K))."""
    k_w, k_b = jax.random.split(key)
    bound = 1.0 / (input_features ** 0.5)
    weight = jax.random.uniform(
        k_w, (num_classes, input_features), jnp.float32, -bound, bound
    )
    bias = jax.random.uniform(k_b, (num_classes,), jnp.float32, -bound, bound)
    return weight, bias


if __name__ == "__main__":
    # Small shapes: batch=2, channels=4, spatial=16x16 -> input_features=1024
    B, C, H, W = 2, 4, 16, 16
    input_features = C * H * W
    num_classes = 10

    key = jax.random.PRNGKey(0)
    k_x, k_p = jax.random.split(key)
    x = jax.random.normal(k_x, (B, C, H, W), dtype=jnp.float32)
    weight, bias = init_class_head_params(k_p, input_features, num_classes)

    # One-time weight transpose / padding (outside the per-call path).
    w_kn, b2d = prepare_class_head_params(weight, bias)

    out = class_head_forward(x, w_kn, b2d, num_classes)
    out = jax.block_until_ready(out)

    # Sanity check against a plain-JAX reference of the PyTorch semantics.
    # Tolerance allows for MXU f32 matmul pass decomposition.
    ref = x.reshape(B, -1) @ weight.T + bias
    assert out.shape == (B, num_classes)
    assert jnp.allclose(out, ref, atol=1e-2, rtol=1e-2), (
        float(jnp.max(jnp.abs(out - ref)))
    )

    print("KERNEL_OK")
</pallas_src>

<mosaic_0001>
module attributes {stable_mosaic.version = 11 : i64} {
  func.func @_linear_kernel(%arg0: i32, %arg1: i32, %arg2: i32, %arg3: memref<8x512xf32, #tpu.memory_space<vmem>>, %arg4: memref<512x128xf32, #tpu.memory_space<vmem>>, %arg5: memref<1x128xf32, #tpu.memory_space<vmem>>, %arg6: memref<8x128xf32, #tpu.memory_space<vmem>>, %arg7: memref<8x128xf32, #tpu.memory_space<vmem>>) attributes {dimension_semantics = [#tpu.dimension_semantics<parallel>, #tpu.dimension_semantics<parallel>, #tpu.dimension_semantics<arbitrary>], iteration_bounds = array<i64: 1, 1, 2>, scalar_prefetch = 0 : i64, scratch_operands = 1 : i64, tpu.core_type = #tpu.core_type<tc>, window_params = [{transform_indices = @transform_0, window_bounds = array<i64: 8, 512>}, {transform_indices = @transform_1, window_bounds = array<i64: 512, 128>}, {transform_indices = @transform_2, window_bounds = array<i64: 1, 128>}, {transform_indices = @transform_3, window_bounds = array<i64: 8, 128>}]} {
    %c0_i32 = arith.constant 0 : i32
    %0 = arith.cmpi eq, %arg2, %c0_i32 : i32
    %1 = arith.extui %0 : i1 to i32
    %c0_i32_0 = arith.constant 0 : i32
    %2 = arith.cmpi ne, %1, %c0_i32_0 : i32
    scf.if %2 {
      %c0_9 = arith.constant 0 : index
      %c0_10 = arith.constant 0 : index
      %12 = vector.load %arg5[%c0_9, %c0_10] : memref<1x128xf32, #tpu.memory_space<vmem>>, vector<1x128xf32>
      %13 = vector.shape_cast %12 : vector<1x128xf32> to vector<1x128xf32>
      %14 = vector.broadcast %13 : vector<1x128xf32> to vector<8x128xf32>
      %c0_11 = arith.constant 0 : index
      %c0_12 = arith.constant 0 : index
      %15 = vector.load %arg7[%c0_11, %c0_12] : memref<8x128xf32, #tpu.memory_space<vmem>>, vector<8x128xf32>
      tpu.vector_store %arg7[%c0_11, %c0_12], %14 {strides = array<i32>} : memref<8x128xf32, #tpu.memory_space<vmem>>, vector<8x128xf32>,
    } else {
    }
    %c0 = arith.constant 0 : index
    %c0_1 = arith.constant 0 : index
    %3 = vector.load %arg7[%c0, %c0_1] : memref<8x128xf32, #tpu.memory_space<vmem>>, vector<8x128xf32>
    %c0_2 = arith.constant 0 : index
    %c0_3 = arith.constant 0 : index
    %4 = vector.load %arg3[%c0_2, %c0_3] : memref<8x512xf32, #tpu.memory_space<vmem>>, vector<8x512xf32>
    %c0_4 = arith.constant 0 : index
    %c0_5 = arith.constant 0 : index
    %5 = vector.load %arg4[%c0_4, %c0_5] : memref<512x128xf32, #tpu.memory_space<vmem>>, vector<512x128xf32>
    %cst = arith.constant dense<0.000000e+00> : vector<8x128xf32>
    %6 = tpu.matmul %4, %5, %cst {dimension_numbers = #tpu.dot_dimension_numbers<[1], [0], [0], [1], [0, 0, 1, 1], [], []>} : vector<8x512xf32>, vector<512x128xf32>, vector<8x128xf32> -> vector<8x128xf32>
    %7 = arith.addf %3, %6 : vector<8x128xf32>
    %c0_6 = arith.constant 0 : index
    %c0_7 = arith.constant 0 : index
    %8 = vector.load %arg7[%c0_6, %c0_7] : memref<8x128xf32, #tpu.memory_space<vmem>>, vector<8x128xf32>
    tpu.vector_store %arg7[%c0_6, %c0_7], %7 {strides = array<i32>} : memref<8x128xf32, #tpu.memory_space<vmem>>, vector<8x128xf32>,
    %c1_i32 = arith.constant 1 : i32
    %9 = arith.cmpi eq, %arg2, %c1_i32 : i32
    %10 = arith.extui %9 : i1 to i32
    %c0_i32_8 = arith.constant 0 : i32
    %11 = arith.cmpi ne, %10, %c0_i32_8 : i32
    scf.if %11 {
      %c0_9 = arith.constant 0 : index
      %c0_10 = arith.constant 0 : index
      %12 = vector.load %arg7[%c0_9, %c0_10] : memref<8x128xf32, #tpu.memory_space<vmem>>, vector<8x128xf32>
      %c0_11 = arith.constant 0 : index
      %c0_12 = arith.constant 0 : index
      %13 = vector.load %arg6[%c0_11, %c0_12] : memref<8x128xf32, #tpu.memory_space<vmem>>, vector<8x128xf32>
      tpu.vector_store %arg6[%c0_11, %c0_12], %12 {strides = array<i32>} : memref<8x128xf32, #tpu.memory_space<vmem>>, vector<8x128xf32>,
    } else {
    }
    return
  }
  func.func @transform_0(%arg0: i32, %arg1: i32, %arg2: i32) -> (i32, i32) {
    %c0_i32 = arith.constant 0 : i32
    return %arg0, %arg2 : i32, i32
  }
  func.func @transform_1(%arg0: i32, %arg1: i32, %arg2: i32) -> (i32, i32) {
    %c0_i32 = arith.constant 0 : i32
    return %arg2, %arg1 : i32, i32
  }
  func.func @transform_2(%arg0: i32, %arg1: i32, %arg2: i32) -> (i32, i32) {
    %c0_i32 = arith.constant 0 : i32
    %c0_i32_0 = arith.constant 0 : i32
    return %c0_i32, %arg1 : i32, i32
  }
  func.func @transform_3(%arg0: i32, %arg1: i32, %arg2: i32) -> (i32, i32) {
    %c0_i32 = arith.constant 0 : i32
    return %arg0, %arg1 : i32, i32
  }
}

</mosaic_0001>

<bundles_post_ra>
// kernel: class_head_forward.1
= control target key start
LH: loop header
LB: loop body
LE: loop exit
PB: predicated region body
PF: predicated region fallthrough
CT: control target
= control target key end

     0   :  { %8 = vsyncpa [#allocation4], 0  ;;  %s1131_s0 = inlined_call_operand.vmem [shape: f32[8,1024], index: 0, kind: input, shape index: {}]   ;;  %s1132_s1 = inlined_call_operand.hbm [shape: f32[1024,128], index: 1, kind: input, shape index: {}]   ;;  %s1133_s2 = inlined_call_operand.vmem [shape: f32[1,128], index: 2, kind: input, shape index: {}]   ;;  %s1134_s3 = inlined_call_operand.vmem [shape: f32[8,128], index: 3, kind: output, shape index: {}]  }
   0x1   :  { %10 = vsyncpa [#allocation4 + $0x1], 0  ;;  %s928_s12 = smov 0   ;;  %s930_s13 = smov 0  }
   0x2   :  { %s932_s14 = smov 0   ;;  %s934_s15 = smov 0  }
   0x3   :  { %s936_s16 = smov 0   ;;  %s938_s17 = smov 0  }
   0x4 LB: > { %s614_s18 = sadd.s32 4294967295, %s903_s17   ;;  %s28_s19 = sadd.s32 1, %s899_s16  ;;  %s903_s17 = sphi %s938_s17, %s16_s17   ;;  %s899_s16 = sphi %s936_s16, %s1142_s16   ;;  %s895_s15 = sphi %s934_s15, %s1141_s15   ;;  %s891_s14 = sphi %s932_s14, %s1140_s14   ;;  %s887_s13 = sphi %s930_s13, %s1139_s13   ;;  %s883_s12 = sphi %s928_s12, %s1138_s12  }
   0x5   : > { %p29_p0 = scmp.ge.s32.totalorder %s28_s19, 2  ;;  %s72_s20 = sadd.s32 1, %s891_s14 }
   0x6   : > { %p79_p1 = scmp.ne.s32.totalorder %s891_s14, %s887_s13  ;;  %p80_p2 = scmp.eq.s32.totalorder %s903_s17, 0 }
   0x7   : > { %s1144_s19 = smov (%p29_p0, %s28_s19), 0  ;;  %p85_p4 = scmp.ne.s32.totalorder %s887_s13, %s883_s12 }
   0x8   : > { %p964_p3 = por %p80_p2, %p79_p1  ;;  %s67_s22 = ssub.s32 %s899_s16, %s1144_s19 }
   0x9   : > { %p86_p5 = scmp.eq.s32.totalorder %s614_s18, 0  ;;  %p70_p6 = scmp.eq.s32.totalorder %s67_s22, 0 }
   0xa   : > { %p772_p8 = scmp.lt.s32.totalorder %s903_s17, 2  ;;  %s182_s25 = sand.u32 1, %s891_s14  }
   0xb   : > { %p971_p7 = por %p86_p5, %p85_p4  ;;  %s631_s26 = sshll.u32 %s899_s16, 13 }
   0xc   : > { %s977_s24 = scalar_select %p70_p6, %s891_s14, %s72_s20  }
   0xd   : > { %s618_s27 = sshll.u32 %s182_s25, 9  ;;  %s984_s30 = scalar_lea.hbm %s1132_s1, %s631_s26 }
   0xe   : > { %s186_s4 = scalar_lea.vmem [#allocation3], %s618_s27  ;;  %p988_p9 = pnand %p772_p8, %p964_p3 }
   0xf   : > { %s194_s5 = sshll.u32 %s186_s4, 4  ;;  %s994_s7 = scalar_lea.sflag [#allocation4], %s182_s25  ;;  %s992_s5 = int_to_ptr.vmem [resolvable:$true] %s194_s5 }
  0x10   : > { %s823_s8 = scalar_lea.hbm %s984_s30, 8192  ;;  %p825_p11 = pneg %p988_p9 }
  0x11   : > { %p824_p10 = scmp.ne.s32.totalorder %s984_s30, %s823_s8  ;;  %s828_s11 = scalar_lea.hbm %s1132_s1, 16384 }
  0x12   : > { %p829_p0 = scmp.lt.u32.totalorder %s984_s30, %s1132_s1  ;;  %p830_p1 = scmp.lt.u32.totalorder %s828_s11, %s823_s8 }
  0x13   : > { %p826_p12 = pnand %p825_p11, %p824_p10  ;;  %p832_p3 = scmp.lt.u32.totalorder %s823_s8, %s984_s30 }
  0x14   : > { %p831_p2 = por %p830_p1, %p829_p0 }
  0x15   : > { %p827_p13 = pneg %p826_p12 }
  0x16   : > { %p833_p4 = por %p832_p3, %p831_p2 }
  0x18   : > { %p834_p5 = pnand %p833_p4, %p827_p13 }
  0x1a   : > { %837 = shalt.err (!%p834_p5)
}
  0x1b   : > { %s838_s20 = scalar_lea.vmem %s992_s5, 8192  ;;  %s905_s21 = smov [#allocation3]  }
  0x1c   : > { %p839_p6 = scmp.ne.s32.totalorder %s992_s5, %s838_s20  ;;  %s843_s22 = sshll.u32 %s905_s21, 4  ;;  %s844_s22 = int_to_ptr.vmem [resolvable:$false] %s843_s22 }
  0x1d   : > { %s845_s25 = scalar_lea.vmem %s844_s22, 16384  ;;  %p846_p12 = scmp.lt.s32.totalorder %s992_s5, %s844_s22 }
  0x1e   : > { %p841_p8 = pnand %p839_p6, %p825_p11  ;;  %p847_p0 = scmp.lt.s32.totalorder %s845_s25, %s838_s20 }
  0x20   : > { %p842_p10 = pneg %p841_p8  ;;  %p848_p1 = por %p847_p0, %p846_p12 }
  0x22   : > { %p849_p2 = pnand %p848_p1, %p842_p10 }
  0x24   : > { %852 = shalt.err (!%p849_p2)
}
  0x25   : > { %s906_s26 = smov 128   ;;  %s907_s27 = smov 8  }
  0x26   : > { %771 = dma.hbm_to_vmem [thread:$0]  (!%p988_p9), %s984_s30, 8192, %s992_s5, %s994_s7, %s906_s26, %s906_s26, %s907_s27  }
  0x27   : > { %p621_p11 = scmp.ge.s32.totalorder %s903_s17, 1  ;;  %p202_p13 = scmp.lt.s32.totalorder %s903_s17, 3 }
  0x29   : > { %p203_p3 = pnand %p621_p11, %p202_p13 }
  0x2a   : > { %s208_s28 = sand.u32 (!%p203_p3), 1, %s887_s13  }
  0x2b   : > { %206 = sbr.rel (%p203_p3) target bundleno = 325 (0x145), region = 32  ;;  %s622_s29 = sshll.u32 (!%p203_p3), %s208_s28, 9 }
  0x2c   : > { %s209_s4 = scalar_lea.sflag (!%p203_p3), [#allocation4], %s208_s28  ;;  %s1025_s8 = scalar_lea.vmem (!%p203_p3), [#allocation3], %s622_s29 }
  0x32   : > { %878 = dma.done.wait (%p971_p7), %s209_s4, 8192  }
  0x33   : > { %880 = vsyncadd (%p971_p7), %s209_s4, 4294959104  ;;  %s623_s9 = sshll.u32 %s895_s15, 2  ;;  %p625_p9 = scmp.ne.s32.totalorder %s895_s15, 0 }
  0x34   : > { %p252_p4 = scmp.lt.s32.totalorder %s623_s9, 7  ;;  %v626_v0 = vld [vmem:[%s1133_s2] ss:$0 sm:$0xff] (!%p625_p9) }
  0x35   : > { %273 = sbr.rel (%p625_p9) target bundleno = 60 (0x3c), region = 40  ;;  %281 = vst [vmem:[#allocation2] sm:$0xff] (!%p625_p9), %v626_v0 }
  0x36   : > { %s1146_s9 = smov (!%p252_p4, %s623_s9), 7 }
  0x37   : > { %s624_s30 = sshll.u32 %s1146_s9, 3 }
  0x38   : > { %s1035_s7 = scalar_lea.vmem %s1131_s0, %s624_s30 }
  0x3c PF: > { %v303_v1 = vld [vmem:[%s1025_s8 + $0x80] sm:$0xff]  ;;  %v304_v2 = vld [vmem:[%s1025_s8 + $0x88] sm:$0xff]  ;;  %v305_v12 = vld [vmem:[%s1025_s8 + $0x90] sm:$0xff]  ;;  %p627_p7 = scmp.ne.s32.totalorder %s895_s15, 1 }
  0x3d   : > { %v335_v3 = vld [vmem:[%s1025_s8 + $0x180] sm:$0xff]  ;;  %v702_v4 = vpack.c.bf16 %v304_v2, %v303_v1  ;;  %v336_v5 = vld [vmem:[%s1025_s8 + $0x188] sm:$0xff]  ;;  %v306_v14 = vld [vmem:[%s1025_s8 + $0x98] sm:$0xff] }
  0x3e   : > { %v287_v6 = vld [vmem:[%s1025_s8] sm:$0xff]  ;;  %v288_v7 = vld [vmem:[%s1025_s8 + $0x8] sm:$0xff]  ;;  %v734_v8 = vpack.c.bf16 %v336_v5, %v335_v3  ;;  %v337_v15 = vld [vmem:[%s1025_s8 + $0x190] sm:$0xff]  ;;  %v706_v17 = vpack.c.bf16 %v306_v14, %v305_v12 }
  0x3f   : > { %v704_v9 = vpack.c.bf16 %v288_v7, %v287_v6  ;;  %v319_v10 = vld [vmem:[%s1025_s8 + $0x100] sm:$0xff]  ;;  %v320_v11 = vld [vmem:[%s1025_s8 + $0x108] sm:$0xff]  ;;  %703 = vmatprep.subr.bf16.mxu0 %v702_v4  ;;  %v338_v16 = vld [vmem:[%s1025_s8 + $0x198] sm:$0xff] }
  0x40   : > { %v736_v13 = vpack.c.bf16 %v320_v11, %v319_v10  ;;  %735 = vmatprep.subr.bf16.mxu1 %v734_v8  ;;  %v738_v18 = vpack.c.bf16 %v338_v16, %v337_v15  ;;  %v289_v19 = vld [vmem:[%s1025_s8 + $0x10] sm:$0xff]  ;;  %v290_v20 = vld [vmem:[%s1025_s8 + $0x18] sm:$0xff]  ;;  %v307_v24 = vld [vmem:[%s1025_s8 + $0xa0] sm:$0xff] }
  0x41   : > { %705 = vmatpush3.bf16.msra.mxu0 %v704_v9  ;;  %v321_v21 = vld [vmem:[%s1025_s8 + $0x110] sm:$0xff]  ;;  %v708_v22 = vpack.c.bf16 %v290_v20, %v289_v19  ;;  %v322_v23 = vld [vmem:[%s1025_s8 + $0x118] sm:$0xff]  ;;  %v308_v25 = vld [vmem:[%s1025_s8 + $0xa8] sm:$0xff] }
  0x42   : > { %737 = vmatpush3.bf16.msra.mxu1 %v736_v13  ;;  %707 = vmatprep.subr.bf16.mxu0 %v706_v17  ;;  %v740_v26 = vpack.c.bf16 %v322_v23, %v321_v21  ;;  %v710_v27 = vpack.c.bf16 %v308_v25, %v307_v24  ;;  %v339_v28 = vld [vmem:[%s1025_s8 + $0x1a0] sm:$0xff]  ;;  %v340_v29 = vld [vmem:[%s1025_s8 + $0x1a8] sm:$0xff]  ;;  %v309_v36 = vld [vmem:[%s1025_s8 + $0xb0] sm:$0xff] }
  0x43   : > { %739 = vmatprep.subr.bf16.mxu1 %v738_v18  ;;  %v291_v30 = vld [vmem:[%s1025_s8 + $0x20] sm:$0xff]  ;;  %v742_v31 = vpack.c.bf16 %v340_v29, %v339_v28  ;;  %v292_v32 = vld [vmem:[%s1025_s8 + $0x28] sm:$0xff]  ;;  %v310_v37 = vld [vmem:[%s1025_s8 + $0xb8] sm:$0xff] }
  0x44   : > { %v323_v33 = vld [vmem:[%s1025_s8 + $0x120] sm:$0xff]  ;;  %v324_v34 = vld [vmem:[%s1025_s8 + $0x128] sm:$0xff]  ;;  %v712_v35 = vpack.c.bf16 %v292_v32, %v291_v30  ;;  %v341_v38 = vld [vmem:[%s1025_s8 + $0x1b0] sm:$0xff]  ;;  %v714_v40 = vpack.c.bf16 %v310_v37, %v309_v36 }
  0x45   : > { %709 = vmatpush3.bf16.msra.mxu0 %v708_v22  ;;  %v744_v39 = vpack.c.bf16 %v324_v34, %v323_v33  ;;  %v342_v41 = vld [vmem:[%s1025_s8 + $0x1b8] sm:$0xff]  ;;  %v293_v42 = vld [vmem:[%s1025_s8 + $0x30] sm:$0xff]  ;;  %v311_v47 = vld [vmem:[%s1025_s8 + $0xc0] sm:$0xff] }
  0x46   : > { %741 = vmatpush3.bf16.msra.mxu1 %v740_v26  ;;  %711 = vmatprep.subr.bf16.mxu0 %v710_v27  ;;  %v294_v43 = vld [vmem:[%s1025_s8 + $0x38] sm:$0xff]  ;;  %v746_v44 = vpack.c.bf16 %v342_v41, %v341_v38  ;;  %v325_v45 = vld [vmem:[%s1025_s8 + $0x130] sm:$0xff]  ;;  %v312_v48 = vld [vmem:[%s1025_s8 + $0xc8] sm:$0xff] }
  0x47   : > { %743 = vmatprep.subr.bf16.mxu1 %v742_v31  ;;  %v326_v46 = vld [vmem:[%s1025_s8 + $0x138] sm:$0xff]  ;;  %v343_v49 = vld [vmem:[%s1025_s8 + $0x1c0] sm:$0xff]  ;;  %v344_v50 = vld [vmem:[%s1025_s8 + $0x1c8] sm:$0xff]  ;;  %v716_v51 = vpack.c.bf16 %v294_v43, %v293_v42  ;;  %v718_v53 = vpack.c.bf16 %v312_v48, %v311_v47 }
  0x48   : > { %v748_v52 = vpack.c.bf16 %v326_v46, %v325_v45  ;;  %v295_v54 = vld [vmem:[%s1025_s8 + $0x40] sm:$0xff]  ;;  %v296_v55 = vld [vmem:[%s1025_s8 + $0x48] sm:$0xff]  ;;  %v750_v57 = vpack.c.bf16 %v344_v50, %v343_v49  ;;  %v313_v59 = vld [vmem:[%s1025_s8 + $0xd0] sm:$0xff] }
  0x49   : > { %713 = vmatpush3.bf16.msra.mxu0 %v712_v35  ;;  %v327_v56 = vld [vmem:[%s1025_s8 + $0x140] sm:$0xff]  ;;  %v328_v58 = vld [vmem:[%s1025_s8 + $0x148] sm:$0xff]  ;;  %v314_v60 = vld [vmem:[%s1025_s8 + $0xd8] sm:$0xff]  ;;  %v720_v63 = vpack.c.bf16 %v296_v55, %v295_v54 }
  0x4a   : > { %745 = vmatpush3.bf16.msra.mxu1 %v744_v39  ;;  %715 = vmatprep.subr.bf16.mxu0 %v714_v40  ;;  %v345_v61 = vld [vmem:[%s1025_s8 + $0x1d0] sm:$0xff]  ;;  %v346_v62 = vld [vmem:[%s1025_s8 + $0x1d8] sm:$0xff]  ;;  %v752_v0 = vpack.c.bf16 %v328_v58, %v327_v56  ;;  %v722_v1 = vpack.c.bf16 %v314_v60, %v313_v59  ;;  %v315_v7 = vld [vmem:[%s1025_s8 + $0xe0] sm:$0xff] }
  0x4b   : > { %747 = vmatprep.subr.bf16.mxu1 %v746_v44  ;;  %v297_v2 = vld [vmem:[%s1025_s8 + $0x50] sm:$0xff]  ;;  %v298_v3 = vld [vmem:[%s1025_s8 + $0x58] sm:$0xff]  ;;  %v754_v5 = vpack.c.bf16 %v346_v62, %v345_v61  ;;  %v316_v8 = vld [vmem:[%s1025_s8 + $0xe8] sm:$0xff] }
  0x4c   : > { %v329_v4 = vld [vmem:[%s1025_s8 + $0x150] sm:$0xff]  ;;  %v330_v6 = vld [vmem:[%s1025_s8 + $0x158] sm:$0xff]  ;;  %v347_v9 = vld [vmem:[%s1025_s8 + $0x1e0] sm:$0xff]  ;;  %v724_v11 = vpack.c.bf16 %v298_v3, %v297_v2  ;;  %v726_v15 = vpack.c.bf16 %v316_v8, %v315_v7 }
  0x4d   : > { %717 = vmatpush3.bf16.msra.mxu0 %v716_v51  ;;  %v348_v10 = vld [vmem:[%s1025_s8 + $0x1e8] sm:$0xff]  ;;  %v299_v12 = vld [vmem:[%s1025_s8 + $0x60] sm:$0xff]  ;;  %v756_v14 = vpack.c.bf16 %v330_v6, %v329_v4  ;;  %v286_v18 = vld [vmem:[%s1035_s7 + $0x18] sm:$0xff] }
  0x4e   : > { %749 = vmatpush3.bf16.msra.mxu1 %v748_v52  ;;  %719 = vmatprep.subr.bf16.mxu0 %v718_v53  ;;  %v300_v13 = vld [vmem:[%s1025_s8 + $0x68] sm:$0xff]  ;;  %v331_v16 = vld [vmem:[%s1025_s8 + $0x160] sm:$0xff]  ;;  %v758_v19 = vpack.c.bf16 %v348_v10, %v347_v9  ;;  %v317_v21 = vld [vmem:[%s1025_s8 + $0xf0] sm:$0xff] }
  0x4f   : > { %751 = vmatprep.subr.bf16.mxu1 %v750_v57  ;;  %v284_v17 = vld [vmem:[%s1035_s7 + $0x8] sm:$0xff]  ;;  %v332_v20 = vld [vmem:[%s1025_s8 + $0x168] sm:$0xff]  ;;  %v318_v22 = vld [vmem:[%s1025_s8 + $0xf8] sm:$0xff]  ;;  %485 = vmatprep.mubr.f32.mxu1 %v286_v18  ;;  %v728_v25 = vpack.c.bf16 %v300_v13, %v299_v12 }
  0x50   : > { %415 = vmatprep.mubr.f32.mxu0 %v284_v17  ;;  %v349_v23 = vld [vmem:[%s1025_s8 + $0x1f0] sm:$0xff]  ;;  %v350_v24 = vld [vmem:[%s1025_s8 + $0x1f8] sm:$0xff]  ;;  %v760_v26 = vpack.c.bf16 %v332_v20, %v331_v16  ;;  %v730_v27 = vpack.c.bf16 %v318_v22, %v317_v21  ;;  %v285_v36 = vld [vmem:[%s1035_s7 + $0x10] sm:$0xff] }
  0x51   : > { %721 = vmatpush3.bf16.msra.mxu0 %v720_v63  ;;  %v301_v28 = vld [vmem:[%s1025_s8 + $0x70] sm:$0xff]  ;;  %v302_v29 = vld [vmem:[%s1025_s8 + $0x78] sm:$0xff]  ;;  %v762_v30 = vpack.c.bf16 %v350_v24, %v349_v23 }
  0x52   : > { %753 = vmatpush3.bf16.msra.mxu1 %v752_v0  ;;  %723 = vmatprep.subr.bf16.mxu0 %v722_v1  ;;  %v333_v31 = vld [vmem:[%s1025_s8 + $0x170] sm:$0xff]  ;;  %v334_v32 = vld [vmem:[%s1025_s8 + $0x178] sm:$0xff]  ;;  %v732_v33 = vpack.c.bf16 %v302_v29, %v301_v28 }
  0x53   : > { %755 = vmatprep.subr.bf16.mxu1 %v754_v5  ;;  %v764_v34 = vpack.c.bf16 %v334_v32, %v333_v31  ;;  %v283_v35 = vld [vmem:[%s1035_s7] sm:$0xff] }
  0x54   : > { %v282_v43 = vld [vmem:[#allocation2] sm:$0xff] }
  0x55   : > { %725 = vmatpush3.bf16.msra.mxu0 %v724_v11 }
  0x56   : > { %757 = vmatpush3.bf16.msra.mxu1 %v756_v14  ;;  %727 = vmatprep.subr.bf16.mxu0 %v726_v15 }
  0x57   : > { %759 = vmatprep.subr.bf16.mxu1 %v758_v19 }
  0x59   : > { %729 = vmatpush3.bf16.msra.mxu0 %v728_v25 }
  0x5a   : > { %761 = vmatpush3.bf16.msra.mxu1 %v760_v26  ;;  %731 = vmatprep.subr.bf16.mxu0 %v730_v27 }
  0x5b   : > { %763 = vmatprep.subr.bf16.mxu1 %v762_v30 }
  0x5d   : > { %733 = vmatpush3.bf16.msra.mxu0 %v732_v33 }
  0x5e   : > { %765 = vmatpush3.bf16.msra.mxu1 %v764_v34 }
  0x60   : > { %416 = vmatmul.mubr.f32.vlgmr.msra.gmra.mrb[0].mxu0 %v283_v35 }
  0x61   : > { %486 = vmatmul.mubr.f32.vlgmr.msra.gmra.mrb[0].mxu1 %v285_v36 }
 0x133   : > { %v664_v37 = vpop.f32.mrb[0].mxu0 }
 0x134   : > { %v699_v38 = vpop.f32.mrb[0].mxu1  ;;  %v665_v39 = vpop.f32.mrb[1].mxu0 }
 0x135   : > { %v666_v40 = vadd.f32 %v665_v39, %v664_v37  ;;  %v700_v41 = vpop.f32.mrb[1].mxu1 }
 0x136   : > { %v701_v42 = vadd.f32 %v700_v41, %v699_v38  ;;  %496 = sbr.rel (%p627_p7) target bundleno = 325 (0x145), region = 44 }
 0x138   : > { %v488_v44 = vadd.f32 %v701_v42, %v666_v40 }
 0x13a   : > { %v491_v45 = vadd.f32 %v488_v44, %v282_v43 }
 0x13c   : > { %492 = vst [vmem:[#allocation2] sm:$0xff] %v491_v45 }
 0x143   : > { %v497_v46 = vld [vmem:[#allocation2] sm:$0xff] }
 0x144   : > { %498 = vst [vmem:[%s1134_s3] sm:$0xff] %v497_v46 }
 0x145 PF: > { %s16_s17 = sadd.s32 1, %s903_s17   ;;  %s1138_s12 = smov %s887_s13 }
 0x146   : > { %p13_p5 = scmp.ge.s32.totalorder %s16_s17, 4   ;;  %s1139_s13 = smov %s891_s14 }
 0x147   : > { %s1140_s14 = smov %s977_s24  ;;  %s1141_s15 = smov %s899_s16 }
 0x148   : > { %s1142_s16 = smov %s1144_s19  ;;  %15 = sbr.rel (!%p13_p5) target bundleno = 4 (0x4), region = 86 }
 0x14f   :  { %524 = vsyncpa [#allocation4], 1 }
 0x150   :  { %526 = vsyncpa [#allocation4 + $0x1], 1 }

</bundles_post_ra>
